<compile_context>
chip_gen: v7x
topology: tpu7x:2x2x1
jax: 0.10.0
libtpu: 0.0.40
codegen_flags: <defaults>
</compile_context>

<pallas_src>
import functools

import jax
import jax.numpy as jnp
from jax.experimental import pallas as pl
from jax.experimental.pallas import tpu as pltpu


def _round_up(x, m):
    return (x + m - 1) // m * m


def _embed_kernel(*refs, v_pad, has_mark):
    """One grid step: embed BT batches' worth of variates with one MXU matmul.

    refs (with mark):    x_ref [BT,L,N], m_ref [BT,L,M], w_ref [L,D],
                         b_ref [1,D] f32, o_ref [BT,V,D]
    refs (without mark): x_ref [BT,L,N], w_ref [L,D], b_ref [1,D], o_ref [BT,N,D]
    """
    if has_mark:
        x_ref, m_ref, w_ref, b_ref, o_ref = refs
    else:
        x_ref, w_ref, b_ref, o_ref = refs
        m_ref = None

    bt, seq_len, _ = x_ref.shape
    v = o_ref.shape[1]
    d = w_ref.shape[1]
    vp = v + v_pad

    w = w_ref[...]                      # [L, D] compute dtype (bf16 default)
    b = b_ref[...]                      # [1, D] f32, broadcasts over rows

    # Fuse x / x_mark (and sublane-alignment padding) along the variate axis
    # in VMEM -> a single matmul and a single store per step.
    parts = [x_ref[...]]
    if m_ref is not None:
        parts.append(m_ref[...])
    if v_pad:
        parts.append(jnp.zeros((bt, seq_len, v_pad), dtype=x_ref.dtype))
    xm = parts[0] if len(parts) == 1 else jnp.concatenate(parts, axis=2)

    # [BT, L, Vp] -> [BT, Vp, L] -> [BT*Vp, L]: variates on sublanes, the L
    # contraction on the lane axis, batch folded into the matmul rows.  Vp is
    # a multiple of 8 so the leading-dim merge is sublane-tile aligned.
    lhs = jnp.transpose(xm, (0, 2, 1)).reshape(bt * vp, seq_len)

    # Cast to compute dtype here, in VMEM (no extra HBM pass); f32 accumulate.
    acc = jnp.dot(lhs.astype(w.dtype), w,
                  preferred_element_type=jnp.float32)            # [BT*Vp, D]
    out = (acc + b).reshape(bt, vp, d)[:, :v, :]
    o_ref[...] = out.astype(o_ref.dtype)                          # lane-dense store


def prepare_params(weight, bias, compute_dtype=jnp.bfloat16):
    """One-time parameter prep (hoisted out of the per-forward path).

    weight: [d_model, c_in]  (PyTorch nn.Linear layout; c_in == seq_len L)
    bias:   [d_model]
    Returns (w_t [L, D] in compute_dtype, bias [1, D] f32).
    Use compute_dtype=jnp.float32 if exact f32 nn.Linear parity is required.
    """
    w_t = jnp.transpose(jnp.asarray(weight), (1, 0)).astype(compute_dtype)
    b2 = jnp.asarray(bias).astype(jnp.float32).reshape(1, -1)
    return w_t, b2


def _pick_batch_tile(batch, vp, target_rows=256):
    """Batches per grid step: fill ~target_rows MXU rows (v6e/v7x = 256) while
    keeping >= 2 grid steps (v7x has 2 TensorCores sharing "parallel" axes)
    and dividing the batch exactly (no padded edge blocks)."""
    bt = max(1, min(batch, target_rows // max(vp, 1)))
    while bt > 1 and (batch + bt - 1) // bt < 2:
        bt -= 1
    while batch % bt:
        bt -= 1
    return bt


@functools.partial(jax.jit, static_argnames=("out_dtype",))
def _data_embedding_inverted_impl(x, x_mark, w_t, b2, *, out_dtype):
    batch, seq_len, n_vars = x.shape
    assert w_t.shape[0] == seq_len, "w_t must be [c_in(=L), d_model]"
    d_model = w_t.shape[1]

    if x_mark is not None and x_mark.shape[2] == 0:
        x_mark = None                       # degenerate mark -> no-mark path
    n_mark = 0 if x_mark is None else x_mark.shape[2]
    v = n_vars + n_mark
    vp = _round_up(v, 8)                    # sublane-aligned rows per batch

    bt = _pick_batch_tile(batch, vp)
    grid = (batch // bt,)

    kernel = functools.partial(_embed_kernel, v_pad=vp - v,
                               has_mark=x_mark is not None)

    in_specs = [pl.BlockSpec((bt, seq_len, n_vars), lambda i: (i, 0, 0))]
    operands = [x]
    if x_mark is not None:
        in_specs.append(pl.BlockSpec((bt, seq_len, n_mark), lambda i: (i, 0, 0)))
        operands.append(x_mark)
    in_specs += [pl.BlockSpec((seq_len, d_model), lambda i: (0, 0)),
                 pl.BlockSpec((1, d_model), lambda i: (0, 0))]
    operands += [w_t, b2]
    out_specs = pl.BlockSpec((bt, v, d_model), lambda i: (i, 0, 0))

    out_bytes = jnp.dtype(out_dtype).itemsize
    in_bytes = (x.size * x.dtype.itemsize
                + (0 if x_mark is None else x_mark.size * x_mark.dtype.itemsize))
    cost = pl.CostEstimate(
        flops=2 * batch * v * seq_len * d_model,
        transcendentals=0,
        bytes_accessed=int(in_bytes
                           + w_t.size * w_t.dtype.itemsize
                           + b2.size * 4
                           + batch * v * d_model * out_bytes),
    )

    # VMEM budget (double-buffered in/out blocks + weight + f32 intermediates)
    # with headroom; lifts v5e's 16 MiB default scoped limit and stays inside
    # v7x's 64 MiB physical VMEM.
    blk_bytes = (bt * seq_len * vp * 4                # fused/padded input block
                 + seq_len * d_model * w_t.dtype.itemsize
                 + bt * vp * d_model * 4              # f32 accumulator
                 + bt * v * d_model * out_bytes)      # output block
    vmem_limit = int(min(max(4 * blk_bytes, 32 << 20), 48 << 20))

    return pl.pallas_call(
        kernel,
        out_shape=jax.ShapeDtypeStruct((batch, v, d_model), out_dtype),
        grid_spec=pltpu.PrefetchScalarGridSpec(
            num_scalar_prefetch=0,
            grid=grid,
            in_specs=in_specs,
            out_specs=out_specs,
        ),
        compiler_params=pltpu.CompilerParams(
            dimension_semantics=("parallel",),
            vmem_limit_bytes=vmem_limit,
        ),
        cost_estimate=cost,
    )(*operands)


def data_embedding_inverted(x, x_mark, w_t, b2, *, out_dtype=jnp.bfloat16):
    """DataEmbedding_inverted.forward (inference mode; Dropout == identity).

    x: [B, L, N]; x_mark: [B, L, M] or None; (w_t, b2) from prepare_params().
    Returns [B, N(+M), D] in out_dtype.
    """
    return _data_embedding_inverted_impl(x, x_mark, w_t, b2, out_dtype=out_dtype)


if __name__ == "__main__":
    # Small shapes consistent with the module:
    #   batch B=4, seq_len (= c_in) L=16, variates N=5, mark features M=3
    #   (V = N+M = 8), d_model D=128 (lane-dense output dim).
    B, L, N, M, D = 4, 16, 5, 3, 128

    key = jax.random.PRNGKey(0)
    kx, km, kw, kb = jax.random.split(key, 4)

    x = jax.random.normal(kx, (B, L, N), dtype=jnp.float32)
    x_mark = jax.random.normal(km, (B, L, M), dtype=jnp.float32)

    # nn.Linear(c_in=L, d_model=D) params, PyTorch layout/init.
    bound = 1.0 / (L ** 0.5)
    weight = jax.random.uniform(kw, (D, L), dtype=jnp.float32,
                                minval=-bound, maxval=bound)
    bias = jax.random.uniform(kb, (D,), dtype=jnp.float32,
                              minval=-bound, maxval=bound)

    w_t, b2 = prepare_params(weight, bias)          # once, at parameter load

    out = jax.block_until_ready(data_embedding_inverted(x, x_mark, w_t, b2))
    assert out.shape == (B, N + M, D), out.shape
    assert out.dtype == jnp.bfloat16, out.dtype

    # Pure-JAX reference on the same bf16-rounded operands (f32 accumulation),
    # matching the kernel's in-VMEM bf16 cast and bf16 output.
    xb = x.astype(jnp.bfloat16).astype(jnp.float32)
    mb = x_mark.astype(jnp.bfloat16).astype(jnp.float32)
    wb = w_t.astype(jnp.float32)                                  # [L, D]
    ref = jnp.einsum("blv,ld->bvd", jnp.concatenate([xb, mb], axis=2), wb,
                     preferred_element_type=jnp.float32) + bias
    ref_bf = ref.astype(jnp.bfloat16).astype(jnp.float32)
    assert jnp.allclose(out.astype(jnp.float32), ref_bf,
                        atol=2e-2, rtol=2e-2), "mismatch vs reference (with mark)"

    # x_mark=None path (exercises the sublane-padding branch: V=5 -> Vp=8).
    out2 = jax.block_until_ready(data_embedding_inverted(x, None, w_t, b2))
    ref2 = jnp.einsum("blv,ld->bvd", xb, wb,
                      preferred_element_type=jnp.float32) + bias
    ref2_bf = ref2.astype(jnp.bfloat16).astype(jnp.float32)
    assert out2.shape == (B, N, D), out2.shape
    assert jnp.allclose(out2.astype(jnp.float32), ref2_bf,
                        atol=2e-2, rtol=2e-2), "mismatch vs reference (no mark)"

    print("KERNEL_OK")
</pallas_src>

<mosaic_0001>
module attributes {stable_mosaic.version = 11 : i64} {
  func.func @_embed_kernel(%arg0: i32, %arg1: memref<2x16x5xf32, #tpu.memory_space<vmem>>, %arg2: memref<2x16x3xf32, #tpu.memory_space<vmem>>, %arg3: memref<16x128xbf16, #tpu.memory_space<vmem>>, %arg4: memref<1x128xf32, #tpu.memory_space<vmem>>, %arg5: memref<2x8x128xbf16, #tpu.memory_space<vmem>>) attributes {dimension_semantics = [#tpu.dimension_semantics<parallel>], iteration_bounds = array<i64: 2>, scalar_prefetch = 0 : i64, scratch_operands = 0 : i64, tpu.core_type = #tpu.core_type<tc>, window_params = [{transform_indices = @transform_0, window_bounds = array<i64: 2, 16, 5>}, {transform_indices = @transform_1, window_bounds = array<i64: 2, 16, 3>}, {pipeline_mode = #tpu.pipeline_mode<synchronous>, transform_indices = @transform_2, window_bounds = array<i64: 16, 128>}, {pipeline_mode = #tpu.pipeline_mode<synchronous>, transform_indices = @transform_3, window_bounds = array<i64: 1, 128>}, {transform_indices = @transform_4, window_bounds = array<i64: 2, 8, 128>}]} {
    %c0 = arith.constant 0 : index
    %c0_0 = arith.constant 0 : index
    %0 = vector.load %arg3[%c0, %c0_0] : memref<16x128xbf16, #tpu.memory_space<vmem>>, vector<16x128xbf16>
    %c0_1 = arith.constant 0 : index
    %c0_2 = arith.constant 0 : index
    %1 = vector.load %arg4[%c0_1, %c0_2] : memref<1x128xf32, #tpu.memory_space<vmem>>, vector<1x128xf32>
    %c0_3 = arith.constant 0 : index
    %c0_4 = arith.constant 0 : index
    %c0_5 = arith.constant 0 : index
    %2 = vector.load %arg1[%c0_3, %c0_4, %c0_5] : memref<2x16x5xf32, #tpu.memory_space<vmem>>, vector<2x16x5xf32>
    %c0_6 = arith.constant 0 : index
    %c0_7 = arith.constant 0 : index
    %c0_8 = arith.constant 0 : index
    %3 = vector.load %arg2[%c0_6, %c0_7, %c0_8] : memref<2x16x3xf32, #tpu.memory_space<vmem>>, vector<2x16x3xf32>
    %4 = tpu.concatenate %2, %3 in 2 : vector<2x16x5xf32>, vector<2x16x3xf32> -> vector<2x16x8xf32>
    %5 = tpu.transpose %4, [0, 2, 1] : vector<2x16x8xf32> -> vector<2x8x16xf32>
    %6 = vector.shape_cast %5 : vector<2x8x16xf32> to vector<16x16xf32>
    %7 = arith.truncf %6 : vector<16x16xf32> to vector<16x16xbf16>
    %cst = arith.constant dense<0.000000e+00> : vector<16x128xf32>
    %8 = tpu.matmul %7, %0, %cst {dimension_numbers = #tpu.dot_dimension_numbers<[1], [0], [0], [1], [0, 0, 1, 1], [], []>} : vector<16x16xbf16>, vector<16x128xbf16>, vector<16x128xf32> -> vector<16x128xf32>
    %9 = vector.broadcast %1 : vector<1x128xf32> to vector<16x128xf32>
    %10 = arith.addf %8, %9 : vector<16x128xf32>
    %11 = vector.shape_cast %10 : vector<16x128xf32> to vector<2x8x128xf32>
    %12 = arith.truncf %11 : vector<2x8x128xf32> to vector<2x8x128xbf16>
    %c0_9 = arith.constant 0 : index
    %c0_10 = arith.constant 0 : index
    %c0_11 = arith.constant 0 : index
    %13 = vector.load %arg5[%c0_9, %c0_10, %c0_11] : memref<2x8x128xbf16, #tpu.memory_space<vmem>>, vector<2x8x128xbf16>
    tpu.vector_store %arg5[%c0_9, %c0_10, %c0_11], %12 {strides = array<i32>} : memref<2x8x128xbf16, #tpu.memory_space<vmem>>, vector<2x8x128xbf16>,
    return
  }
  func.func @transform_0(%arg0: i32) -> (i32, i32, i32) {
    %c0_i32 = arith.constant 0 : i32
    %c0_i32_0 = arith.constant 0 : i32
    %c0_i32_1 = arith.constant 0 : i32
    return %arg0, %c0_i32, %c0_i32_0 : i32, i32, i32
  }
  func.func @transform_1(%arg0: i32) -> (i32, i32, i32) {
    %c0_i32 = arith.constant 0 : i32
    %c0_i32_0 = arith.constant 0 : i32
    %c0_i32_1 = arith.constant 0 : i32
    return %arg0, %c0_i32, %c0_i32_0 : i32, i32, i32
  }
  func.func @transform_2(%arg0: i32) -> (i32, i32) {
    %c0_i32 = arith.constant 0 : i32
    %c0_i32_0 = arith.constant 0 : i32
    %c0_i32_1 = arith.constant 0 : i32
    return %c0_i32, %c0_i32_0 : i32, i32
  }
  func.func @transform_3(%arg0: i32) -> (i32, i32) {
    %c0_i32 = arith.constant 0 : i32
    %c0_i32_0 = arith.constant 0 : i32
    %c0_i32_1 = arith.constant 0 : i32
    return %c0_i32, %c0_i32_0 : i32, i32
  }
  func.func @transform_4(%arg0: i32) -> (i32, i32, i32) {
    %c0_i32 = arith.constant 0 : i32
    %c0_i32_0 = arith.constant 0 : i32
    %c0_i32_1 = arith.constant 0 : i32
    return %arg0, %c0_i32, %c0_i32_0 : i32, i32, i32
  }
}

</mosaic_0001>

<bundles_post_ra>
// kernel: _data_embedding_inverted_impl.1
= control target key start
LH: loop header
LB: loop body
LE: loop exit
PB: predicated region body
PF: predicated region fallthrough
CT: control target
= control target key end

     0   :  { %9 = vsyncpa [#allocation3], 0  ;;  %s779_s0 = inlined_call_operand.vmem [shape: f32[4,16,5], index: 0, kind: input, shape index: {}]   ;;  %s780_s1 = inlined_call_operand.vmem [shape: f32[4,16,3], index: 1, kind: input, shape index: {}]   ;;  %s781_s2 = inlined_call_operand.vmem [shape: bf16[16,128], index: 2, kind: input, shape index: {}]   ;;  %s782_s3 = inlined_call_operand.vmem [shape: f32[1,128], index: 3, kind: input, shape index: {}]   ;;  %s783_s4 = inlined_call_operand.hbm [shape: bf16[4,8,128], index: 4, kind: output, shape index: {}]  }
   0x1   :  { %11 = vsyncpa [#allocation3 + $0x1], 0  ;;  %s668_s15 = smov 0   ;;  %s670_s16 = smov 0  }
   0x2   :  { %s672_s17 = smov 0   ;;  %s674_s18 = smov 0  }
   0x3 LB: > { %s689_s19 = sadd.s32 4294967295, %s635_s18   ;;  %s474_s20 = sadd.s32 4294967294, %s635_s18   ;;  %s635_s18 = sphi %s674_s18, %s789_s18   ;;  %s631_s17 = sphi %s672_s17, %s788_s17   ;;  %s627_s16 = sphi %s670_s16, %s787_s16   ;;  %s623_s15 = sphi %s668_s15, %s786_s15  }
   0x4   : > { %s693_s21 = sadd.s32 1, %s635_s18   ;;  %s118_s22 = sadd.s32 1, %s631_s17 }
   0x5   : > { %s115_s23 = ssub.s32 %s635_s18, %s693_s21  ;;  %p128_p0 = scmp.ne.s32.totalorder %s631_s17, %s627_s16 }
   0x6   : > { %p116_p1 = scmp.eq.s32.totalorder %s115_s23, 0  ;;  %p129_p2 = scmp.eq.s32.totalorder %s689_s19, 1 }
   0x7   : > { %p134_p3 = scmp.ne.s32.totalorder %s627_s16, %s623_s15  ;;  %p135_p4 = scmp.eq.s32.totalorder %s474_s20, 1 }
   0x8   : > { %s704_s24 = scalar_select %p116_p1, %s631_s17, %s118_s22  }
   0x9   : > { %p706_p5 = por %p129_p2, %p128_p0  ;;  %p710_p6 = por %p135_p4, %p134_p3 }
   0xa   : > { %p477_p7 = scmp.ge.s32.totalorder %s635_s18, 1  ;;  %p179_p8 = scmp.lt.s32.totalorder %s635_s18, 3 }
   0xc   : > { %p180_p9 = pnand %p477_p7, %p179_p8 }
   0xd   : > { %s479_s27 = sshll.u32 (!%p180_p9), %s689_s19, 1  ;;  %s637_s6 = smov (!%p180_p9), 5   ;;  %vm255_vm0 = vcmask (!%p180_p9), 39936   ;;  %v572_v19 = vld [vmem:[%s781_s2] sm:$0xff] (!%p180_p9)   ;;  %v638_v22 = vmov (!%p180_p9), 0.0   ;;  %vm639_vm1 = vmmov (!%p180_p9), 0  }
   0xe   : > { %183 = sbr.rel (%p180_p9) target bundleno = 513 (0x201), region = 36  ;;  %p213_p10 = scmp.lt.s32.totalorder (!%p180_p9), %s479_s27, 3  ;;  %503 = vmatprep.subr.bf16.mxu0 (!%p180_p9), %v638_v22  ;;  %505 = vmatprep.mubr.msk.bf16.mxu0 (!%p180_p9), %vm639_vm1, %v638_v22  ;;  %vm337_vm2 = vcmask (!%p180_p9), 130048   ;;  %v485_v28 = vld [vmem:[%s782_s3] ss:$0 sm:$0xff] (!%p180_p9) }
   0xf   : > { %504 = vmatpush3.bf16.msra.mxu0 (!%p180_p9), %v572_v19  ;;  %s209_s12 = sand.u32 (!%p180_p9), 1, %s627_s16  }
  0x10   : > { %s478_s13 = sshll.u32 (!%p180_p9), %s209_s12, 3 }
  0x11   : > { %s211_s22 = scalar_lea.vmem (!%p180_p9), [#allocation2], %s478_s13 }
  0x12   : > { %s400_s23 = sshll.u32 (!%p180_p9), %s211_s22, 4  ;;  %s731_s23 = int_to_ptr.vmem [resolvable:$true] %s400_s23 }
  0x15   : > { %s791_s27 = smov (!%p213_p10, %s479_s27), 3 }
  0x16   : > { %s493_s28 = sshll.u32 %s791_s27, 4  ;;  %s495_s27 = sshll.u32 %s689_s19, 7 }
  0x17   : > { %s224_s5 = scalar_lea.vmem %s780_s1, %s493_s28  ;;  %s217_s9 = scalar_lea.vmem %s779_s0, %s493_s28 }
  0x18   : > { %v235_v0 = vld [vmem:[%s224_s5] sm:$0xff]  ;;  %v237_v1 = vld [vmem:[%s224_s5 + $0x10] sm:$0xff]  ;;  %v236_v2 = vld [vmem:[%s224_s5 + $0x8] sm:$0xff]  ;;  %s736_s30 = scalar_lea.hbm %s783_s4, %s495_s27  ;;  %s640_s19 = smov [#allocation2]  }
  0x19   : > { %v553_v3 = vpack.i.bf16 %v237_v1, %v235_v0  ;;  %v238_v4 = vld [vmem:[%s224_s5 + $0x18] sm:$0xff]  ;;  %v231_v7 = vld [vmem:[%s217_s9] sm:$0xff]  ;;  %v233_v8 = vld [vmem:[%s217_s9 + $0x10] sm:$0xff]  ;;  %s738_s5 = scalar_lea.sflag [#allocation3], %s209_s12  ;;  %s577_s7 = sshll.u32 %s640_s19, 4  ;;  %s578_s7 = int_to_ptr.vmem [resolvable:$false] %s577_s7 }
  0x1a   : > { %v558_v5 = vpack.i.bf16 %v238_v4, %v236_v2  ;;  %v232_v15 = vld [vmem:[%s217_s9 + $0x8] sm:$0xff]  ;;  %v234_v16 = vld [vmem:[%s217_s9 + $0x18] sm:$0xff]  ;;  %s579_s8 = scalar_lea.vmem %s578_s7, 256  ;;  %p580_p0 = scmp.lt.s32.totalorder %s731_s23, %s578_s7 }
  0x1b   : > { %554 = vrot.lane.b32.xlu0 %v553_v3, %s637_s6 }
  0x1f   : > { %559 = vrot.lane.b32.xlu0 %v558_v5, %s637_s6  ;;  %s573_s6 = scalar_lea.vmem %s731_s23, 128 }
  0x20   : > { %p574_p11 = scmp.ne.s32.totalorder %s731_s23, %s573_s6  ;;  %p581_p1 = scmp.lt.s32.totalorder %s579_s8, %s573_s6 }
  0x22   : > { %p575_p12 = pnand %p574_p11, %p706_p5  ;;  %p582_p2 = por %p581_p1, %p580_p0 }
  0x24   : > { %p576_p13 = pneg %p575_p12 }
  0x26   : > { %p583_p3 = pnand %p582_p2, %p576_p13 }
  0x8d   : > { %v555_v6 = vpop.permute.xlu0 %554 }
  0x8e   : > { %v557_v9 = vunpack.i.h.bf16 %v555_v6  ;;  %v556_v10 = vunpack.i.l.bf16 %v555_v6 }
  0x90   : > { %v256_v11 = vsel %vm255_vm0, %v231_v7, %v556_v10  ;;  %v258_v12 = vsel %vm255_vm0, %v233_v8, %v557_v9 }
  0x91   : > { %v560_v13 = vpop.permute.xlu0 %559  ;;  %v563_v14 = vpack.i.bf16 %v258_v12, %v256_v11 }
  0x92   : > { %v562_v17 = vunpack.i.h.bf16 %v560_v13  ;;  %v561_v18 = vunpack.i.l.bf16 %v560_v13 }
  0x93   : > { %564 = vxpose.xlu1.b32.start [1/2] (short) (narrow) %v563_v14, 8 }
  0x94   : > { %v257_v20 = vsel %vm255_vm0, %v232_v15, %v561_v18  ;;  %v259_v21 = vsel %vm255_vm0, %v234_v16, %v562_v17 }
  0x95   : > { %v565_v23 = vpack.i.bf16 %v259_v21, %v257_v20 }
  0x97   : > { %566 = vxpose.xlu1.b32.end [2/2] (short) (narrow) %v565_v23, 8 }
 0x113   : > { %v567_v24 = vpop.trf.xlu1 }
 0x114   : > { %v571_v25 = vunpack.i.h.bf16 %v567_v24  ;;  %v568_v26 = vunpack.i.l.bf16 %v567_v24 }
 0x116   : > { %v324_v27 = vpack.c.bf16 %v571_v25, %v568_v26 }
 0x118   : > { %506 = vmatmul.mubr.msk.bf16.vlgmr.msra.gmra.mrb[0].mxu0 %vm337_vm2, %v324_v27 }
 0x1eb   : > { %v375_v29 = vpop.f32.mrb[0].mxu0 }
 0x1ec   : > { %v507_v30 = vpop.f32.mrb[1].mxu0  ;;  %v376_v32 = vadd.f32 %v485_v28, %v375_v29 }
 0x1ed   : > { %v378_v31 = vpop.f32.mrb[2].mxu0 }
 0x1ee   : > { %v379_v33 = vadd.f32 %v485_v28, %v378_v31  ;;  %v508_v34 = vpop.f32.mrb[3].mxu0 }
 0x1f0   : > { %v499_v35 = vpack.c.bf16 %v379_v33, %v376_v32 }
 0x1f2   : > { %500 = vst [vmem:[%s211_s22] sm:$0xff] %v499_v35  }
 0x1f3   : > { %586 = shalt.err (!%p583_p3)
}
 0x1f4   : > { %s587_s9 = scalar_lea.hbm %s736_s30, 128  ;;  %s591_s12 = scalar_lea.hbm %s783_s4, 256 }
 0x1f5   : > { %p588_p4 = scmp.ne.s32.totalorder %s736_s30, %s587_s9  ;;  %p592_p9 = scmp.lt.u32.totalorder %s736_s30, %s783_s4 }
 0x1f6   : > { %p593_p10 = scmp.lt.u32.totalorder %s591_s12, %s587_s9  ;;  %p595_p12 = scmp.lt.u32.totalorder %s587_s9, %s736_s30 }
 0x1f7   : > { %p589_p7 = pnand %p588_p4, %p706_p5 }
 0x1f8   : > { %p594_p11 = por %p593_p10, %p592_p9 }
 0x1f9   : > { %p590_p8 = pneg %p589_p7 }
 0x1fa   : > { %p596_p13 = por %p595_p12, %p594_p11 }
 0x1fc   : > { %p597_p0 = pnand %p596_p13, %p590_p8 }
 0x1fe   : > { %600 = shalt.err (!%p597_p0)
}
 0x1ff   : > { %s641_s20 = smov 64   ;;  %s642_s22 = smov 4  }
 0x200   : > { %509 = dma.vmem_to_hbm [thread:$0]  (%p706_p5), %s731_s23, 128, %s736_s30, %s738_s5, %s641_s20, %s641_s20, %s642_s22  }
 0x201 PF: > { %p515_p1 = scmp.ge.s32.totalorder %s635_s18, 2  ;;  %s415_s27 = sand.u32 1, %s623_s15  }
 0x202   : > { %s416_s28 = scalar_lea.sflag [#allocation3], %s415_s27 }
 0x203   : > { %p512_p2 = pnand %p515_p1, %p710_p6 }
 0x205   : > { %618 = dma.done.wait (!%p512_p2), %s416_s28, 128  }
 0x206   : > { %620 = vsyncadd (!%p512_p2), %s416_s28, 4294967168  ;;  %p14_p3 = scmp.ge.s32.totalorder %s693_s21, 4   ;;  %s786_s15 = smov %s627_s16 }
 0x207   : > { %s787_s16 = smov %s631_s17  ;;  %s788_s17 = smov %s704_s24 }
 0x208   : > { %s789_s18 = smov %s693_s21  ;;  %16 = sbr.rel (!%p14_p3) target bundleno = 3 (0x3), region = 74 }
 0x20f   :  { %421 = vsyncpa [#allocation3], 1 }
 0x210   :  { %423 = vsyncpa [#allocation3 + $0x1], 1 }

</bundles_post_ra>
